<compile_context>
chip_gen: v5e
topology: v5e:2x2
jax: 0.10.0
libtpu: 0.0.40
codegen_flags: <defaults>
</compile_context>

<pallas_src>
import jax
import jax.numpy as jnp
from jax.experimental import pallas as pl
from jax.experimental.pallas import tpu as pltpu

LANE = 128


def _round_up(v, m):
    return (v + m - 1) // m * m


def _cdiv(a, b):
    return -(-a // b)


# ----------------------------------------------------------------------------
# Kernels: fused 1x1-squeeze-conv -> sigmoid -> gating multiply
# ----------------------------------------------------------------------------
def _spatial_attention_kernel(x_ref, w_ref, b_ref, o_ref):
    """Generic path (rows == C): channel reduce + sublane broadcast.

    x_ref: (1, C, T) input tile   w_ref: (C, 1) conv weight
    b_ref: (1, 1) SMEM bias       o_ref: (1, C, T) gated output tile
    """
    xf = x_ref[0].astype(jnp.float32)                               # (C, T)
    z = jnp.sum(xf * w_ref[...], axis=0, keepdims=True) + b_ref[0, 0]   # (1, T)
    g = pl.reciprocal(1.0 + jnp.exp(-z), approx=False)              # sigmoid (exp on EUP)
    o_ref[0] = (xf * g).astype(o_ref.dtype)


def _spatial_attention_packed_kernel(x_ref, m_ref, b_ref, o_ref):
    """Packed path (rows = b_blk*C = 8): several batch images share the sublanes.

    m_ref is a (rows, rows) gating matrix with M[i, j] = w[j % C] when rows i, j
    belong to the same batch image, else 0.  jnp.dot(M, x) therefore produces the
    per-image 1x1-conv response already broadcast to every channel row.
    """
    xf = x_ref[0].astype(jnp.float32)                               # (R, T)
    z = jnp.dot(m_ref[...], xf, preferred_element_type=jnp.float32) + b_ref[0, 0]
    g = pl.reciprocal(1.0 + jnp.exp(-z), approx=False)              # sigmoid
    o_ref[0] = (xf * g).astype(o_ref.dtype)


# ----------------------------------------------------------------------------
# Wrapper: layout plumbing + pallas_call
# ----------------------------------------------------------------------------
def spatial_attention(x, weight, bias, *, target_block_bytes=2 << 20, min_grid_steps=8):
    """SpatialAttention forward.

    x: (N, C, H, W) NCHW (f32 or bf16); weight: (1, C, 1, 1); bias: (1,).
    Returns (N, C, H, W) in x.dtype.
    """
    n, c, h, w = x.shape
    assert weight.shape == (1, c, 1, 1), weight.shape
    assert bias.shape == (1,), bias.shape
    hw = h * w
    itemsize = jnp.dtype(x.dtype).itemsize

    # --- pack batch images into the 8-sublane dim for tiny channel counts ------
    b_blk = 1
    if c < 8 and 8 % c == 0 and n % (8 // c) == 0:
        b_blk = 8 // c
    rows = b_blk * c
    nb = n // b_blk

    # --- lane-dense tile sized by a byte budget (f32-equivalent, ~2 MiB) -------
    tile_budget = max(LANE, (target_block_bytes // (rows * 4)) // LANE * LANE)
    tile = min(_round_up(hw, LANE), tile_budget)

    # Ensure enough grid steps for 2-TensorCore sharding on v7x (keep >=512 lanes).
    if nb * _cdiv(hw, tile) < min_grid_steps:
        want_j = _cdiv(min_grid_steps, nb)
        floor_tile = min(512, _round_up(hw, LANE))
        tile = min(tile, max(floor_tile, _round_up(_cdiv(hw, want_j), LANE)))

    grid = (nb, _cdiv(hw, tile))

    # --- VMEM budget: 2x double-buffered in/out blocks + in-kernel f32 temps ---
    io_block = rows * tile * itemsize
    f32_block = rows * tile * 4
    vmem_need = 4 * io_block + 6 * f32_block + (1 << 20)
    if vmem_need > (48 << 20):
        # TODO(synk): channel-blocked two-pass path (z accumulator) for very large C.
        raise NotImplementedError("channel count too large for single-pass VMEM tiling")
    vmem_limit = int(min(48 << 20, max(4 << 20, vmem_need)))

    # --- operands (reshapes touch leading dims only -> free, no HBM pass) ------
    x3 = x.reshape(nb, rows, hw)
    b2d = bias.reshape(1, 1).astype(jnp.float32)
    wvec = weight.reshape(c).astype(jnp.float32)

    if b_blk > 1:
        grp = jnp.arange(rows) // c
        wmat = jnp.where(grp[:, None] == grp[None, :],
                         jnp.tile(wvec, b_blk)[None, :], 0.0).astype(jnp.float32)
        kernel = _spatial_attention_packed_kernel
        w_arg = wmat
        w_spec = pl.BlockSpec((rows, rows), lambda i, j: (0, 0))
    else:
        kernel = _spatial_attention_kernel
        w_arg = wvec.reshape(c, 1)
        w_spec = pl.BlockSpec((c, 1), lambda i, j: (0, 0))

    cost = pl.CostEstimate(
        flops=3 * n * c * hw,                 # squeeze mul+add, gate mul
        transcendentals=n * hw,               # sigmoid exp
        bytes_accessed=2 * n * c * hw * itemsize + c * 4 + 4,
    )

    out3 = pl.pallas_call(
        kernel,
        out_shape=jax.ShapeDtypeStruct((nb, rows, hw), x.dtype),
        grid=grid,
        in_specs=[
            pl.BlockSpec((1, rows, tile), lambda i, j: (i, 0, j)),   # x tile
            w_spec,                                                  # conv weight (constant)
            pl.BlockSpec(memory_space=pltpu.MemorySpace.SMEM),       # conv bias scalar
        ],
        out_specs=pl.BlockSpec((1, rows, tile), lambda i, j: (i, 0, j)),
        compiler_params=pltpu.CompilerParams(
            dimension_semantics=("parallel", "parallel"),
            vmem_limit_bytes=vmem_limit,
        ),
        cost_estimate=cost,
    )(x3, w_arg, b2d)

    return out3.reshape(n, c, h, w)


# ----------------------------------------------------------------------------
# Pure-JAX reference (correctness check)
# ----------------------------------------------------------------------------
def spatial_attention_ref(x, weight, bias):
    xf = x.astype(jnp.float32)
    z = jnp.einsum("nchw,c->nhw", xf, weight.reshape(-1).astype(jnp.float32))
    z = z[:, None, :, :] + bias.reshape(1, 1, 1, 1).astype(jnp.float32)
    z = jax.nn.sigmoid(z)
    return (xf * z).astype(x.dtype)


if __name__ == "__main__":
    root = jax.random.PRNGKey(0)

    def run_case(n, c, h, w, dtype=jnp.float32, atol=1e-5, rtol=1e-5, **kw):
        kx, kw_, kb = jax.random.split(jax.random.fold_in(root, n * 10000 + c * 100 + h), 3)
        x = jax.random.normal(kx, (n, c, h, w), dtype=jnp.float32).astype(dtype)
        weight = 0.5 * jax.random.normal(kw_, (1, c, 1, 1), dtype=jnp.float32)
        bias = 0.1 * jax.random.normal(kb, (1,), dtype=jnp.float32)

        out = jax.block_until_ready(spatial_attention(x, weight, bias, **kw))
        ref = jax.block_until_ready(spatial_attention_ref(x, weight, bias))

        assert out.shape == x.shape and out.dtype == x.dtype, (out.shape, out.dtype)
        of, rf = out.astype(jnp.float32), ref.astype(jnp.float32)
        err = float(jnp.max(jnp.abs(of - rf)))
        assert jnp.allclose(of, rf, rtol=rtol, atol=atol), err

    # Spec shape: SpatialAttention(dim=4) on (2, 4, 16, 16) NCHW -> packed path.
    run_case(2, 4, 16, 16)
    # Generic path (C == 8, fully dense sublanes).
    run_case(2, 8, 16, 16)
    # Generic path with ragged spatial tail (HW = 225, forced 128-lane tiles).
    run_case(2, 3, 15, 15, target_block_bytes=1 << 10)
    # bf16 streamed natively through HBM, f32 math inside the kernel.
    run_case(2, 4, 16, 16, dtype=jnp.bfloat16, atol=5e-2, rtol=5e-2)

    print("KERNEL_OK")
</pallas_src>

<mosaic_0001>
module attributes {stable_mosaic.version = 11 : i64} {
  func.func @_spatial_attention_packed_kernel(%arg0: i32, %arg1: i32, %arg2: memref<1x8x256xf32, #tpu.memory_space<vmem>>, %arg3: memref<8x8xf32, #tpu.memory_space<vmem>>, %arg4: memref<1x1xf32, #tpu.memory_space<smem>>, %arg5: memref<1x8x256xf32, #tpu.memory_space<vmem>>) attributes {dimension_semantics = [#tpu.dimension_semantics<parallel>, #tpu.dimension_semantics<parallel>], iteration_bounds = array<i64: 1, 1>, scalar_prefetch = 0 : i64, scratch_operands = 0 : i64, tpu.core_type = #tpu.core_type<tc>, window_params = [{transform_indices = @transform_0, window_bounds = array<i64: 1, 8, 256>}, {pipeline_mode = #tpu.pipeline_mode<synchronous>, transform_indices = @transform_1, window_bounds = array<i64: 8, 8>}, {transform_indices = @transform_2, window_bounds = array<i64: 1, 1>}, {transform_indices = @transform_3, window_bounds = array<i64: 1, 8, 256>}]} {
    %c0 = arith.constant 0 : index
    %c0_0 = arith.constant 0 : index
    %c0_1 = arith.constant 0 : index
    %0 = vector.load %arg2[%c0, %c0_0, %c0_1] : memref<1x8x256xf32, #tpu.memory_space<vmem>>, vector<1x8x256xf32>
    %1 = vector.shape_cast %0 : vector<1x8x256xf32> to vector<8x256xf32>
    %c0_2 = arith.constant 0 : index
    %c0_3 = arith.constant 0 : index
    %2 = vector.load %arg3[%c0_2, %c0_3] : memref<8x8xf32, #tpu.memory_space<vmem>>, vector<8x8xf32>
    %cst = arith.constant dense<0.000000e+00> : vector<8x256xf32>
    %3 = tpu.matmul %2, %1, %cst {dimension_numbers = #tpu.dot_dimension_numbers<[1], [0], [0], [1], [0, 0, 1, 1], [], []>} : vector<8x8xf32>, vector<8x256xf32>, vector<8x256xf32> -> vector<8x256xf32>
    %c0_4 = arith.constant 0 : index
    %c0_5 = arith.constant 0 : index
    %4 = memref.load %arg4[%c0_4, %c0_5] : memref<1x1xf32, #tpu.memory_space<smem>>
    %5 = vector.broadcast %4 : f32 to vector<8x256xf32>
    %6 = arith.addf %3, %5 : vector<8x256xf32>
    %cst_6 = arith.constant 0.000000e+00 : f32
    %7 = vector.broadcast %cst_6 : f32 to vector<8x256xf32>
    %8 = arith.subf %7, %6 : vector<8x256xf32>
    %9 = math.exp %8 : vector<8x256xf32>
    %cst_7 = arith.constant 1.000000e+00 : f32
    %10 = vector.broadcast %cst_7 : f32 to vector<8x256xf32>
    %11 = arith.addf %10, %9 : vector<8x256xf32>
    %12 = tpu.reciprocal %11 : vector<8x256xf32> -> vector<8x256xf32>
    %13 = arith.mulf %1, %12 : vector<8x256xf32>
    %c0_8 = arith.constant 0 : index
    %c0_9 = arith.constant 0 : index
    %c0_10 = arith.constant 0 : index
    %14 = vector.load %arg5[%c0_8, %c0_9, %c0_10] : memref<1x8x256xf32, #tpu.memory_space<vmem>>, vector<1x8x256xf32>
    %15 = vector.shape_cast %14 : vector<1x8x256xf32> to vector<8x256xf32>
    %16 = vector.shape_cast %13 : vector<8x256xf32> to vector<1x8x256xf32>
    tpu.vector_store %arg5[%c0_8, %c0_9, %c0_10], %16 {strides = array<i32>} : memref<1x8x256xf32, #tpu.memory_space<vmem>>, vector<1x8x256xf32>,
    return
  }
  func.func @transform_0(%arg0: i32, %arg1: i32) -> (i32, i32, i32) {
    %c0_i32 = arith.constant 0 : i32
    %c0_i32_0 = arith.constant 0 : i32
    return %arg0, %c0_i32, %arg1 : i32, i32, i32
  }
  func.func @transform_1(%arg0: i32, %arg1: i32) -> (i32, i32) {
    %c0_i32 = arith.constant 0 : i32
    %c0_i32_0 = arith.constant 0 : i32
    %c0_i32_1 = arith.constant 0 : i32
    return %c0_i32, %c0_i32_0 : i32, i32
  }
  func.func @transform_2(%arg0: i32, %arg1: i32) -> (i32, i32) {
    %c0_i32 = arith.constant 0 : i32
    %c0_i32_0 = arith.constant 0 : i32
    %c0_i32_1 = arith.constant 0 : i32
    return %c0_i32, %c0_i32_0 : i32, i32
  }
  func.func @transform_3(%arg0: i32, %arg1: i32) -> (i32, i32, i32) {
    %c0_i32 = arith.constant 0 : i32
    %c0_i32_0 = arith.constant 0 : i32
    return %arg0, %c0_i32, %arg1 : i32, i32, i32
  }
}

</mosaic_0001>

<bundles_post_ra>
// kernel: tpu_custom_call.1
= control target key start
LH: loop header
LB: loop body
LE: loop exit
PB: predicated region body
PF: predicated region fallthrough
CT: control target
= control target key end

     0   :  { %9 = vsyncpa [#allocation4], 0  ;;  %s277_s0 = inlined_call_operand.hbm [shape: f32[1,8,256], index: 0, kind: input, shape index: {}]   ;;  %s278_s1 = inlined_call_operand.hbm [shape: f32[8,8], index: 1, kind: input, shape index: {}]   ;;  %s279_s2 = inlined_call_operand.<no memory space> [shape: f32[1,1], index: 2, kind: input, shape index: {}]   ;;  %s280_s3 = inlined_call_operand.hbm [shape: f32[1,8,256], index: 3, kind: output, shape index: {}]  }
   0x1   :  { %10 = vsyncpa [#allocation7], 0 }
   0x2   :  { %11 = vsyncpa [#allocation5], 0  ;;  %s17_s14 = sshll.u32 %s277_s0, 4  ;;  %s242_s15 = smov [#allocation3]   ;;  %s18_s14 = int_to_ptr.hbm [resolvable:$true] %s17_s14 }
   0x3   :  { %s19_s16 = sshll.u32 %s242_s15, 4  ;;  %s28_s19 = sshll.u32 %s278_s1, 4  ;;  %s20_s16 = int_to_ptr.vmem [resolvable:$true] %s19_s16  ;;  %s29_s19 = int_to_ptr.hbm [resolvable:$true] %s28_s19 }
   0x4   :  { %22 = dma.hbm_to_vmem [thread:$0]  %s18_s14, 256, %s20_s16, [#allocation4]  }
   0x5   :  { %s243_s20 = smov [#allocation6]  }
   0x6   :  { %s30_s21 = sshll.u32 %s243_s20, 4  ;;  %s31_s21 = int_to_ptr.vmem [resolvable:$true] %s30_s21 }
   0x7   :  { %33 = dma.hbm_to_vmem [thread:$0]  %s29_s19, 128, %s31_s21, [#allocation7]  }
   0x8   :  { %236 = dma.done.wait [#allocation4], 256  }
   0x9   :  { %237 = vsyncadd [#allocation4], 4294967040 }
   0xa   :  { %238 = dma.done.wait [#allocation7], 128  }
   0xb   :  { %239 = vsyncadd [#allocation7], 4294967168  ;;  %vm49_vm0 = vcmask 64512   ;;  %v44_v0 = vld [vmem:[#allocation3] sm:$0xff]  ;;  %v45_v1 = vld [vmem:[#allocation3 + $0x8] sm:$0xff]  ;;  %v48_v3 = vstv %s279_s2  ;;  %s244_s2 = smov [#allocation8]  }
   0xc   :  { %v46_v2 = vld [vmem:[#allocation6] sm:$0xff]  ;;  %68 = vmatpush.msra.mxu0 %v44_v0  ;;  %88 = vmatpush.msra.mxu1 %v45_v1  ;;  %s138_s22 = sshll.u32 %s244_s2, 4  ;;  %s140_s25 = sshll.u32 %s280_s3, 4  ;;  %s139_s22 = int_to_ptr.vmem [resolvable:$true] %s138_s22  ;;  %s141_s25 = int_to_ptr.hbm [resolvable:$true] %s140_s25 }
   0xd   :  { %151 = vmatmul.msk.f32.vlgmr.msra.gmra.mxu0 %vm49_vm0, %v46_v2  ;;  %152 = vmatmul.msk.f32.vlgmr.msra.gmra.mxu1 %vm49_vm0, %v46_v2 }
  0x8a   :  { %v70_v4 = vpop.f32.mrf.mxu0  ;;  %v90_v5 = vpop.f32.mrf.mxu1 }
  0x8b   :  { %v71_v6 = vadd.f32 %v70_v4, %v48_v3  ;;  %v91_v7 = vadd.f32 %v90_v5, %v48_v3 }
  0x8d   :  { %v93_v8 = vsub.f32 0.0, %v71_v6  ;;  %v94_v9 = vsub.f32 0.0, %v91_v7 }
  0x8f   :  { %v95_v10 = vmul.f32 1.442695, %v93_v8  ;;  %v97_v11 = vmul.f32 1.442695, %v94_v9 }
  0x91   :  { %156 = vpow2.f32 %v95_v10 }
  0x92   :  { %158 = vpow2.f32 %v97_v11 }
  0x97   :  { %v157_v12 = vpop.eup %156 }
  0x98   :  { %v159_v13 = vpop.eup %158  ;;  %v99_v14 = vadd.f32 1.0, %v157_v12 }
  0x99   :  { %v100_v15 = vadd.f32 1.0, %v159_v13 }
  0x9a   :  { %160 = vrcp.f32 %v99_v14  ;;  %v112_v22 = vand.u32 2147483648, %v99_v14  ;;  %v110_v24 = vand.u32 2147483647, %v99_v14  ;;  %vm106_vm3 = vweird.f32 %v99_v14 }
  0x9b   :  { %162 = vrcp.f32 %v100_v15  ;;  %v126_v25 = vand.u32 2147483648, %v100_v15  ;;  %v124_v27 = vand.u32 2147483647, %v100_v15  ;;  %vm120_vm5 = vweird.f32 %v100_v15 }
  0x9c   :  { %v113_v29 = vor.u32 1.1754944e-38, %v112_v22  ;;  %vm111_vm6 = vcmp.eq.f32.partialorder %v110_v24, 8.507059e+37 }
  0x9d   :  { %v127_v32 = vor.u32 1.1754944e-38, %v126_v25  ;;  %vm125_vm8 = vcmp.eq.f32.partialorder %v124_v27, 8.507059e+37 }
  0xa0   :  { %v161_v16 = vpop.eup %160 }
  0xa1   :  { %v163_v17 = vpop.eup %162  ;;  %v102_v18 = vmul.f32 %v161_v16, %v99_v14  ;;  %vm107_vm1 = vweird.f32 %v161_v16 }
  0xa2   :  { %v116_v19 = vmul.f32 %v163_v17, %v100_v15  ;;  %vm121_vm2 = vweird.f32 %v163_v17  ;;  %vm108_vm4 = vmor %vm106_vm3, %vm107_vm1 }
  0xa3   :  { %v103_v20 = vsub.f32 1.0, %v102_v18  ;;  %vm122_vm7 = vmor %vm120_vm5, %vm121_vm2 }
  0xa4   :  { %v117_v21 = vsub.f32 1.0, %v116_v19 }
  0xa5   :  { %v104_v23 = vmul.f32 %v161_v16, %v103_v20 }
  0xa6   :  { %v118_v26 = vmul.f32 %v163_v17, %v117_v21 }
  0xa7   :  { %v105_v28 = vadd.f32 %v161_v16, %v104_v23 }
  0xa8   :  { %v119_v30 = vadd.f32 %v163_v17, %v118_v26 }
  0xa9   :  { %v109_v31 = vsel %vm108_vm4, %v161_v16, %v105_v28 }
  0xaa   :  { %v114_v33 = vsel %vm111_vm6, %v113_v29, %v109_v31  ;;  %v123_v34 = vsel %vm122_vm7, %v163_v17, %v119_v30 }
  0xab   :  { %v128_v35 = vsel %vm125_vm8, %v127_v32, %v123_v34  ;;  %v129_v36 = vmul.f32 %v114_v33, %v44_v0 }
  0xac   :  { %v130_v37 = vmul.f32 %v128_v35, %v45_v1 }
  0xad   :  { %131 = vst [vmem:[#allocation8] sm:$0xff] %v129_v36 }
  0xae   :  { %132 = vst [vmem:[#allocation8 + $0x8] sm:$0xff] %v130_v37 }
  0xaf   :  { %143 = dma.vmem_to_hbm [thread:$0]  %s139_s22, 256, %s141_s25, [#allocation5]  }
  0xb0   :  { %240 = dma.done.wait [#allocation5], 256  }
  0xb1   :  { %241 = vsyncadd [#allocation5], 4294967040 }
  0xb2   :  { %148 = vsyncpa [#allocation4], 1 }
  0xb3   :  { %149 = vsyncpa [#allocation7], 1 }
  0xb4   :  { %150 = vsyncpa [#allocation5], 1 }

</bundles_post_ra>
